<compile_context>
chip_gen: v6e
topology: v6e:2x2x1
jax: 0.10.0
libtpu: 0.0.40
codegen_flags: <defaults>
</compile_context>

<pallas_src>
import math

import jax
import jax.numpy as jnp
import numpy as np
from jax import lax
from jax.experimental import pallas as pl
from jax.experimental.pallas import tpu as pltpu

EPS = 1e-5                      # BatchNorm1d default eps
CP = 128                        # lane-dense channel padding (vreg lane width)
N_MEL = 80                      # upconv2 output channels (mel bins)
MXU_DTYPE = jnp.bfloat16        # MXU operand dtype; stats/elementwise stay f32

# order in which packed params are passed to the fused pallas_call
PACK_ORDER = [
    "w_asr", "b_asr", "w_f0", "b_f0", "w_fc", "b_fc",
    "w_c1", "g1", "be1",
    "w_c2", "g2", "be2",
    "w_u1", "g3", "be3",
    "w_u2", "b_u2",
]

# --------------------------- roll-direction probe ---------------------------

_ROLL_SIGN = None


def _roll_sign():
    """pltpu.roll follows jnp.roll semantics; this one-time 8x128 probe pins
    the rotation direction so the conv tap-alignment shifts stay correct
    across jax/Mosaic versions."""
    global _ROLL_SIGN
    if _ROLL_SIGN is None:
        def k(x_ref, o_ref):
            o_ref[...] = pltpu.roll(x_ref[...], 1, 0)
        x = jnp.arange(8 * CP, dtype=jnp.float32).reshape(8, CP)
        y = pl.pallas_call(
            k, out_shape=jax.ShapeDtypeStruct((8, CP), jnp.float32))(x)
        _ROLL_SIGN = 1 if bool(jnp.array_equal(y, jnp.roll(x, 1, axis=0))) else -1
    return _ROLL_SIGN


# ------------------------------ fused kernel -------------------------------

def _make_fused_kernel(B, S, La, Lf, Lc, L3, Lmel):
    """Fully-fused forward kernel.  All sequence data lives in a shared
    'row frame': B blocks of S rows (S 8-aligned), valid data starting at row
    ORI=2 of each block, zeros elsewhere (conv halos)."""
    BS = B * S
    ORI = 2
    sign = _roll_sign()
    f32 = jnp.float32

    def kernel(frame_ref, spk_ref,
               w_asr, b_asr, w_f0, b_f0, w_fc, b_fc,
               w_c1, g1, be1,
               w_c2, g2, be2,
               w_u1, g3, be3,
               w_u2, b_u2,
               o_ref):
        rows = lax.broadcasted_iota(jnp.int32, (BS, 1), 0)

        def region_mask(off, length):
            m = None
            for b in range(B):
                lo = b * S + off
                cur = (rows >= lo) & (rows < lo + length)
                m = cur if m is None else jnp.logical_or(m, cur)
            return m.astype(f32)

        m_asr = region_mask(ORI, La)            # asr segment of the concat
        m_f0 = region_mask(ORI + La, Lf)        # f0 segment of the concat
        m_c = region_mask(ORI, Lc)              # conv1/conv2 output rows
        m_3 = region_mask(ORI, L3)              # upconv1 output rows

        def conv(x, w_ref, pad):
            # One batch-folded (BS,128)@(128,128) bf16 MXU matmul per tap;
            # tap alignment via pltpu.roll (XLU slot), f32 accumulation.
            xb = x.astype(MXU_DTYPE)
            y = None
            for k in range(w_ref.shape[0]):
                t = jnp.dot(xb, w_ref[k], preferred_element_type=f32)
                sh = (sign * (pad - k)) % BS
                if sh:
                    t = pltpu.roll(t, sh, 0)
                y = t if y is None else y + t
            return y

        def batchnorm(y, mask, n, g_ref, be_ref):
            # Single-pass batch-statistics BatchNorm1d: masked sum / sum-of-
            # squares in f32, rsqrt on the EUP, affine fused in-register.
            ym = y * mask
            s1 = jnp.sum(ym, axis=0, keepdims=True)
            s2 = jnp.sum(ym * y, axis=0, keepdims=True)
            mean = s1 * (1.0 / n)
            var = jnp.maximum(s2 * (1.0 / n) - mean * mean, 0.0)
            scale = g_ref[...] * lax.rsqrt(var + EPS)
            shift = be_ref[...] - mean * scale
            return y * scale + shift

        # fc_speaker for the whole batch, broadcast to the stacked row frame.
        spk_all = jnp.dot(spk_ref[...], w_fc[...],
                          preferred_element_type=f32) + b_fc[...]
        spk_big = None
        for b in range(B):
            mb = ((rows >= b * S) & (rows < (b + 1) * S)).astype(f32)
            t = mb * spk_all[b:b + 1, :]
            spk_big = t if spk_big is None else spk_big + t

        # ---- conv_asr / conv_f0 (valid convs) + length-concat -------------
        # asr weights read only lanes [0:asr_dim], f0 weights only lanes
        # [asr_dim:asr_dim+f0_dim]; their valid output rows are disjoint, so
        # the length-concat is just a masked sum in the shared row frame.
        x = frame_ref[...]
        ya = conv(x, w_asr, 1)
        yf = conv(x, w_f0, 1)
        x = m_asr * (ya + b_asr[...]) + m_f0 * (yf + b_f0[...])

        # ---- conv1 + bn1 + speaker + relu ----------------------------------
        # (conv bias omitted: exactly cancelled by the BN mean subtraction)
        y = conv(x, w_c1, 1)
        y = batchnorm(y, m_c, float(B * Lc), g1, be1)
        x = jnp.maximum(y + spk_big, 0.0) * m_c

        # ---- conv2 + bn2 + speaker + relu ----------------------------------
        y = conv(x, w_c2, 1)
        y = batchnorm(y, m_c, float(B * Lc), g2, be2)
        x = jnp.maximum(y + spk_big, 0.0) * m_c

        # ---- upconv1: ConvTranspose1d(k=4,s=1,p=1) == conv with flipped /
        # swapped weights and pad 2, then bn3 (no speaker add, no relu) ------
        y = conv(x, w_u1, 2)
        x = batchnorm(y, m_3, float(B * L3), g3, be3) * m_3

        # ---- upconv2 + bias + tanh; channel-sliced NCL mel written directly
        y = conv(x, w_u2, 2) + b_u2[...]
        for b in range(B):
            blk = jnp.transpose(y[b * S:(b + 1) * S, :], (1, 0))   # (CP, S)
            o_ref[b] = jnp.tanh(blk[0:N_MEL, ORI:ORI + Lmel])

    return kernel


# ------------------------------ forward pass -------------------------------

def generator_forward(packed, asr_features, f0_features, speaker_features):
    """asr_features:     (B, T_asr, asr_dim)
       f0_features:      (B, f0_dim, T_f0)    (NCL, exactly as fed to conv_f0)
       speaker_features: (B, speaker_dim)
       returns the mel spectrogram (B, 80, L_mel) in PyTorch NCL layout."""
    B, T_asr, asr_dim = asr_features.shape
    f0_nlc = jnp.transpose(f0_features, (0, 2, 1))    # tiny one-time transpose
    T_f0, f0_dim = f0_nlc.shape[1], f0_nlc.shape[2]

    La, Lf = T_asr - 2, T_f0 - 2
    Lc = La + Lf
    L3, Lmel = Lc + 1, Lc + 2
    S = ((Lc + 5 + 7) // 8) * 8              # 8-aligned per-batch row block

    # Host-side one-time packing of the two inputs into a single lane-dense
    # 128-lane row frame (asr in lanes [0:asr_dim], f0 in lanes
    # [asr_dim:asr_dim+f0_dim]); placement makes the fused taps compute both
    # valid convs and the length-concat directly in the frame.
    frame = jnp.zeros((B, S, CP), jnp.float32)
    frame = frame.at[:, 1:1 + T_asr, 0:asr_dim].set(asr_features)
    frame = frame.at[:, 1 + La:1 + La + T_f0, asr_dim:asr_dim + f0_dim].set(f0_nlc)
    frame = frame.reshape(B * S, CP)

    kernel = _make_fused_kernel(B, S, La, Lf, Lc, L3, Lmel)

    n_dots = 6 + 3 + 3 + 4 + 4
    flops = 2 * (B * S) * CP * CP * n_dots + 2 * B * speaker_features.shape[1] * CP
    trans = B * N_MEL * Lmel + 3 * CP
    nbytes = (frame.size * 4 + speaker_features.size * 4 + B * N_MEL * Lmel * 4
              + sum(int(np.prod(packed[k].shape)) * packed[k].dtype.itemsize
                    for k in PACK_ORDER))

    out = pl.pallas_call(
        kernel,
        out_shape=jax.ShapeDtypeStruct((B, N_MEL, Lmel), jnp.float32),
        compiler_params=pltpu.CompilerParams(vmem_limit_bytes=32 * 1024 * 1024),
        cost_estimate=pl.CostEstimate(flops=int(flops), transcendentals=int(trans),
                                      bytes_accessed=int(nbytes)),
    )(frame, speaker_features, *[packed[k] for k in PACK_ORDER])

    # TODO(synk): pretrained UnivNet vocoder (convert_spectrogram_to_audio) is
    # an external NeMo model with no Pallas equivalent; return the mel.
    return out


# ------------------------- deterministic parameters ------------------------

def init_params(key, asr_dim, f0_dim, speaker_dim, output_dim):
    """PyTorch-layout parameters (used by the reference and by pack_params)."""
    C2, C4 = output_dim // 2, output_dim // 4
    keys = jax.random.split(key, 14)

    def u(k, shape, fan_in):
        b = 1.0 / math.sqrt(fan_in)
        return jax.random.uniform(k, shape, jnp.float32, -b, b)

    return dict(
        w_asr=u(keys[0], (output_dim, asr_dim, 3), asr_dim * 3),
        b_asr=u(keys[7], (output_dim,), asr_dim * 3),
        w_f0=u(keys[1], (output_dim, f0_dim, 3), f0_dim * 3),
        b_f0=u(keys[8], (output_dim,), f0_dim * 3),
        w_c1=u(keys[2], (C2, output_dim, 3), output_dim * 3),
        b_c1=u(keys[9], (C2,), output_dim * 3),
        w_c2=u(keys[3], (C2, C2, 3), C2 * 3),
        b_c2=u(keys[10], (C2,), C2 * 3),
        w_fc=u(keys[4], (C2, speaker_dim), speaker_dim),
        b_fc=u(keys[11], (C2,), speaker_dim),
        w_u1=u(keys[5], (C2, C4, 4), C2 * 4),          # ConvTranspose1d (I, O, K)
        b_u1=u(keys[12], (C4,), C2 * 4),
        w_u2=u(keys[6], (C4, N_MEL, 4), C4 * 4),
        b_u2=u(keys[13], (N_MEL,), C4 * 4),
        g1=jnp.ones((C2,), jnp.float32), be1=jnp.zeros((C2,), jnp.float32),
        g2=jnp.ones((C2,), jnp.float32), be2=jnp.zeros((C2,), jnp.float32),
        g3=jnp.ones((C4,), jnp.float32), be3=jnp.zeros((C4,), jnp.float32),
    )


def pack_params(p):
    """One-time conversion to the layouts consumed by the fused kernel:
    per-tap (K, 128, 128) bf16 conv weights (channels last, padded rows/cols
    zero), (1, 128) f32 bias/gamma/beta rows.  conv1/conv2/upconv1 biases are
    dropped (exactly cancelled by the BN mean subtraction)."""
    asr_dim = p["w_asr"].shape[1]

    def row(v):                                  # (C,) -> (1, CP) f32
        return jnp.zeros((1, CP), jnp.float32).at[0, :v.shape[0]].set(v)

    def conv_w(w_oik, in_off=0):                 # (O, I, K) -> (K, CP, CP) bf16
        Od, I, K = w_oik.shape
        kio = jnp.transpose(w_oik, (2, 1, 0))
        out = jnp.zeros((K, CP, CP), jnp.float32)
        out = out.at[:, in_off:in_off + I, :Od].set(kio)
        return out.astype(MXU_DTYPE)

    def convT_w(w_iok):                          # (I, O, K) -> flipped conv bf16
        I, Od, K = w_iok.shape
        kio = jnp.transpose(jnp.flip(w_iok, axis=2), (2, 0, 1))
        out = jnp.zeros((K, CP, CP), jnp.float32)
        out = out.at[:, :I, :Od].set(kio)
        return out.astype(MXU_DTYPE)

    C2, sd = p["w_fc"].shape
    w_fc = jnp.zeros((sd, CP), jnp.float32).at[:, :C2].set(jnp.transpose(p["w_fc"]))

    return dict(
        w_asr=conv_w(p["w_asr"], 0), b_asr=row(p["b_asr"]),
        w_f0=conv_w(p["w_f0"], asr_dim), b_f0=row(p["b_f0"]),
        w_fc=w_fc, b_fc=row(p["b_fc"]),
        w_c1=conv_w(p["w_c1"]), g1=row(p["g1"]), be1=row(p["be1"]),
        w_c2=conv_w(p["w_c2"]), g2=row(p["g2"]), be2=row(p["be2"]),
        w_u1=convT_w(p["w_u1"]), g3=row(p["g3"]), be3=row(p["be3"]),
        w_u2=convT_w(p["w_u2"]), b_u2=row(p["b_u2"]),
    )


# ------------------------- pure-JAX reference (NCL) ------------------------

def ref_forward(p, asr, f0, spk):
    def conv_ncl(x, w_oik, b, pad):
        y = lax.conv_general_dilated(x, w_oik, (1,), [(pad, pad)],
                                     dimension_numbers=("NCH", "OIH", "NCH"))
        return y + b[None, :, None]

    def convT_ncl(x, w_iok, b, pad):             # stride-1 transposed conv
        K = w_iok.shape[2]
        y = lax.conv_general_dilated(x, jnp.flip(w_iok, axis=2), (1,),
                                     [(K - 1 - pad, K - 1 - pad)],
                                     dimension_numbers=("NCH", "IOH", "NCH"))
        return y + b[None, :, None]

    def bn(x, g, be):
        m = jnp.mean(x, axis=(0, 2), keepdims=True)
        v = jnp.mean((x - m) ** 2, axis=(0, 2), keepdims=True)
        return g[None, :, None] * (x - m) / jnp.sqrt(v + EPS) + be[None, :, None]

    a = conv_ncl(jnp.transpose(asr, (0, 2, 1)), p["w_asr"], p["b_asr"], 0)
    f = conv_ncl(f0, p["w_f0"], p["b_f0"], 0)
    x = jnp.concatenate([a, f], axis=2)
    s = spk @ jnp.transpose(p["w_fc"]) + p["b_fc"]
    x = bn(conv_ncl(x, p["w_c1"], p["b_c1"], 1), p["g1"], p["be1"])
    x = jax.nn.relu(x + s[:, :, None])
    x = bn(conv_ncl(x, p["w_c2"], p["b_c2"], 1), p["g2"], p["be2"])
    x = jax.nn.relu(x + s[:, :, None])
    x = bn(convT_ncl(x, p["w_u1"], p["b_u1"], 1), p["g3"], p["be3"])
    x = jnp.tanh(convT_ncl(x, p["w_u2"], p["b_u2"], 1))
    return x


# ----------------------------------- main -----------------------------------

if __name__ == "__main__":
    asr_dim, f0_dim, speaker_dim, output_dim = 12, 6, 16, 32
    B, T_asr, T_f0 = 2, 10, 10

    _roll_sign()                                 # pin pltpu.roll direction once

    key = jax.random.PRNGKey(0)
    kp, ka, kf, ks = jax.random.split(key, 4)
    p = init_params(kp, asr_dim, f0_dim, speaker_dim, output_dim)
    packed = pack_params(p)                      # one-time padded/bf16 packing

    asr = jax.random.normal(ka, (B, T_asr, asr_dim), jnp.float32)
    f0 = jax.random.normal(kf, (B, f0_dim, T_f0), jnp.float32)   # NCL like PyTorch
    spk = jax.random.normal(ks, (B, speaker_dim), jnp.float32)

    fwd = jax.jit(generator_forward)
    mel = jax.block_until_ready(fwd(packed, asr, f0, spk))

    L_mel = (T_asr - 2) + (T_f0 - 2) + 2
    assert mel.shape == (B, N_MEL, L_mel), mel.shape

    ref = ref_forward(p, asr, f0, spk)
    # bf16 MXU operands vs. the f32 XLA reference -> slightly looser tolerance.
    np.testing.assert_allclose(np.asarray(mel), np.asarray(ref),
                               atol=5e-2, rtol=5e-2)
    print("KERNEL_OK")
</pallas_src>

<mosaic_0001>
module attributes {stable_mosaic.version = 11 : i64} {
  func.func @k(%arg0: memref<8x128xf32, #tpu.memory_space<vmem>>, %arg1: memref<8x128xf32, #tpu.memory_space<vmem>>) attributes {dimension_semantics = [], scalar_prefetch = 0 : i64, scratch_operands = 0 : i64, tpu.core_type = #tpu.core_type<tc>} {
    %c0 = arith.constant 0 : index
    %c0_0 = arith.constant 0 : index
    %0 = vector.load %arg0[%c0, %c0_0] : memref<8x128xf32, #tpu.memory_space<vmem>>, vector<8x128xf32>
    %c1_i32 = arith.constant 1 : i32
    %1 = tpu.dynamic_rotate %0 by %c1_i32 dim 0 : vector<8x128xf32>, i32 -> vector<8x128xf32>
    %c0_1 = arith.constant 0 : index
    %c0_2 = arith.constant 0 : index
    %2 = vector.load %arg1[%c0_1, %c0_2] : memref<8x128xf32, #tpu.memory_space<vmem>>, vector<8x128xf32>
    tpu.vector_store %arg1[%c0_1, %c0_2], %1 {strides = array<i32>} : memref<8x128xf32, #tpu.memory_space<vmem>>, vector<8x128xf32>,
    return
  }
}

</mosaic_0001>

<bundles_post_ra>
// kernel: tpu_custom_call.1
= control target key start
LH: loop header
LB: loop body
LE: loop exit
PB: predicated region body
PF: predicated region fallthrough
CT: control target
= control target key end

     0   :  { %6 = vsyncpa [#allocation3], 0  ;;  %s103_s0 = inlined_call_operand.hbm [shape: f32[8,128], index: 0, kind: input, shape index: {}]   ;;  %s104_s1 = inlined_call_operand.hbm [shape: f32[8,128], index: 1, kind: output, shape index: {}]  }
   0x1   :  { %7 = vsyncpa [#allocation4], 0  ;;  %s85_s6 = smov [#allocation2]  }
   0x2   :  { %s14_s7 = sshll.u32 %s85_s6, 4  ;;  %s15_s7 = int_to_ptr.vmem [resolvable:$true] %s14_s7 }
   0x3   :  { %s49_s8 = scalar_lea.vmem %s15_s7, 128  ;;  %p54_p1 = scmp.lt.s32.totalorder %s15_s7, %s15_s7 }
   0x4   :  { %p50_p0 = scmp.ne.s32.totalorder %s15_s7, %s49_s8  ;;  %p55_p2 = scmp.lt.s32.totalorder %s49_s8, %s49_s8 }
   0x6   :  { %p56_p3 = por %p55_p2, %p54_p1 }
   0x8   :  { %p57_p4 = pnand %p56_p3, %p50_p0 }
   0xa   :  { %60 = shalt.err (!%p57_p4)
}
   0xb   :  { %17 = dma.hbm_to_vmem [thread:$0]  %s103_s0, 128, %s15_s7, [#allocation3]  }
   0xc   :  { %81 = dma.done.wait [#allocation3], 128  }
   0xd   :  { %82 = vsyncadd [#allocation3], 4294967168  ;;  %s86_s11 = smov [#allocation5]   ;;  %v21_v0 = vld [vmem:[#allocation2] sm:$0xff] }
   0xe   :  { %s30_s12 = sshll.u32 %s86_s11, 4  ;;  %v22_v1 = vrot.slane %v21_v0, 7  ;;  %s31_s12 = int_to_ptr.vmem [resolvable:$true] %s30_s12 }
   0xf   :  { %s61_s13 = scalar_lea.vmem %s31_s12, 128  ;;  %p66_p6 = scmp.lt.s32.totalorder %s31_s12, %s31_s12 }
  0x10   :  { %23 = vst [vmem:[#allocation5] sm:$0xff] %v22_v1  ;;  %p62_p5 = scmp.ne.s32.totalorder %s31_s12, %s61_s13  ;;  %p67_p7 = scmp.lt.s32.totalorder %s61_s13, %s61_s13 }
  0x12   :  { %p68_p8 = por %p67_p7, %p66_p6 }
  0x14   :  { %p69_p9 = pnand %p68_p8, %p62_p5 }
  0x16   :  { %72 = shalt.err (!%p69_p9)
}
  0x17   :  { %33 = dma.vmem_to_hbm [thread:$0]  %s31_s12, 128, %s104_s1, [#allocation4]  }
  0x18   :  { %83 = dma.done.wait [#allocation4], 128  }
  0x19   :  { %84 = vsyncadd [#allocation4], 4294967168 }
  0x1a   :  { %37 = vsyncpa [#allocation3], 1 }
  0x1b   :  { %38 = vsyncpa [#allocation4], 1 }

</bundles_post_ra>
